<compile_context>
chip_gen: v6e
topology: v6e:2x2x1
jax: 0.10.0
libtpu: 0.0.40
codegen_flags: <defaults>
</compile_context>

<pallas_src>
import jax
import jax.numpy as jnp
from jax.experimental import pallas as pl
from jax.experimental.pallas import tpu as pltpu


def _round_up(v, m):
    return ((v + m - 1) // m) * m


# ----------------------------------------------------------------------------
# Pallas kernel:  out = relu( (A @ X) @ W + b ),  tiled over (row block, k block)
# ----------------------------------------------------------------------------
def gcn_relu_kernel(a_ref, x_ref, w_ref, b_ref, o_ref, acc_ref):
    k = pl.program_id(1)

    @pl.when(k == 0)
    def _zero_acc():
        acc_ref[...] = jnp.zeros_like(acc_ref)

    # bf16 A-tile @ bf16 X-tile -> f32 accumulator (MXU).
    acc_ref[...] += jnp.dot(
        a_ref[...], x_ref[...], preferred_element_type=jnp.float32
    )

    @pl.when(k == pl.num_programs(1) - 1)
    def _epilogue():
        # Small (T, Fp) @ (Fp, Hp) feature transform in f32, then bias + ReLU.
        h = jnp.dot(acc_ref[...], w_ref[...], preferred_element_type=jnp.float32)
        o_ref[...] = jnp.maximum(h + b_ref[...], 0.0).astype(o_ref.dtype)


def gcn_conv_relu(a_hat_padded_bf16, n_valid, x, w, b):
    """relu(A_hat @ X @ W + b) via a tiled Pallas kernel.

    a_hat_padded_bf16: (Np, Np) bf16 normalized adjacency, zero outside
    [:n_valid, :n_valid]."""
    Np = a_hat_padded_bf16.shape[0]
    N, F = x.shape
    H = w.shape[1]

    Fp = _round_up(F, 128)                 # lane-dense contraction dim
    Hp = _round_up(H, 128)                 # lane-dense output dim
    T = min(512, _round_up(N, 128))        # adaptive row / reduction tile
    assert Np % T == 0

    # Zero-padded, dtype-adjusted operands.  X in bf16 (MXU + HBM BW),
    # W and bias in f32 (tiny, keeps the epilogue precise).
    x_p = jnp.zeros((Np, Fp), jnp.bfloat16).at[:N, :F].set(x.astype(jnp.bfloat16))
    w_p = jnp.zeros((Fp, Hp), jnp.float32).at[:F, :H].set(w.astype(jnp.float32))
    b_p = jnp.zeros((1, Hp), jnp.float32).at[0, :H].set(b.astype(jnp.float32))

    grid = (Np // T, Np // T)

    out_p = pl.pallas_call(
        gcn_relu_kernel,
        out_shape=jax.ShapeDtypeStruct((Np, Hp), jnp.float32),
        grid_spec=pltpu.PrefetchScalarGridSpec(
            num_scalar_prefetch=0,
            grid=grid,
            in_specs=[
                pl.BlockSpec((T, T), lambda i, k: (i, k)),    # A_hat tile
                pl.BlockSpec((T, Fp), lambda i, k: (k, 0)),   # X tile
                pl.BlockSpec((Fp, Hp), lambda i, k: (0, 0)),  # W (resident)
                pl.BlockSpec((1, Hp), lambda i, k: (0, 0)),   # bias (resident)
            ],
            out_specs=pl.BlockSpec((T, Hp), lambda i, k: (i, 0)),
            scratch_shapes=[pltpu.VMEM((T, Fp), jnp.float32)],
        ),
        compiler_params=pltpu.CompilerParams(
            dimension_semantics=("parallel", "arbitrary"),
            vmem_limit_bytes=32 * 1024 * 1024,
        ),
    )(a_hat_padded_bf16, x_p, w_p, b_p)

    return out_p[:n_valid, :H]


# ----------------------------------------------------------------------------
# Host-side glue: dense D^{-1/2}(A + I)D^{-1/2}, PyG gcn_norm semantics.
# Built directly at the padded size (padded rows/cols stay exactly zero).
# ----------------------------------------------------------------------------
def build_normalized_adjacency_padded(edge_index, num_nodes, padded_nodes):
    src, dst = edge_index[0], edge_index[1]
    ones = jnp.ones(src.shape[0], jnp.float32)
    # dense adjacency: row = dst (aggregating node), col = src (message sender)
    a = jnp.zeros((padded_nodes, padded_nodes), jnp.float32).at[dst, src].add(ones)
    # add_remaining_self_loops semantics: every real node ends with exactly one
    # self-loop of weight 1 (existing self-loops are not double-counted).
    idx = jnp.arange(num_nodes)
    a = a.at[idx, idx].set(1.0)
    deg = a.sum(axis=1)
    dinv = jnp.where(deg > 0, jax.lax.rsqrt(deg), 0.0)   # padded rows -> 0
    a_norm = a * dinv[:, None] * dinv[None, :]
    return a_norm.astype(jnp.bfloat16)


class SingleNetPallas:
    """JAX/Pallas port of Single_Net: GCNConv(num_features, 64) + ReLU."""

    def __init__(self, num_features, hidden=64, key=jax.random.PRNGKey(0)):
        kw, _ = jax.random.split(key)
        limit = jnp.sqrt(6.0 / (num_features + hidden)).astype(jnp.float32)
        self.weight = jax.random.uniform(
            kw, (num_features, hidden), jnp.float32, -limit, limit
        )
        self.bias = jnp.zeros((hidden,), jnp.float32)

    def __call__(self, x, edge_index):
        N = x.shape[0]
        T = min(512, _round_up(N, 128))
        Np = _round_up(N, T)
        a_hat_p = build_normalized_adjacency_padded(edge_index, N, Np)
        return gcn_conv_relu(a_hat_p, N, x, self.weight, self.bias)


def reference_forward(x, edge_index, w, b):
    # Same bf16 input rounding as the kernel; math in f32 at highest precision.
    N = x.shape[0]
    a_hat = build_normalized_adjacency_padded(edge_index, N, N)  # (N, N) bf16
    a_f = a_hat.astype(jnp.float32)
    x_f = x.astype(jnp.bfloat16).astype(jnp.float32)
    ax = jnp.dot(a_f, x_f, precision=jax.lax.Precision.HIGHEST)
    h = jnp.dot(ax, w, precision=jax.lax.Precision.HIGHEST)
    return jnp.maximum(h + b[None, :], 0.0)


if __name__ == "__main__":
    key = jax.random.PRNGKey(0)
    k_x, k_src, k_dst, k_param = jax.random.split(key, 4)

    N = 16          # number of graph nodes
    F = 32          # input feature dim (data.num_features stand-in)
    H = 64          # GCNConv output dim
    E = 40          # number of directed edges

    x = jax.random.normal(k_x, (N, F), jnp.float32)
    src = jax.random.randint(k_src, (E,), 0, N, jnp.int32)
    dst = jax.random.randint(k_dst, (E,), 0, N, jnp.int32)
    edge_index = jnp.stack([src, dst], axis=0)   # [2, E], PyG convention

    net = SingleNetPallas(num_features=F, hidden=H, key=k_param)

    out = net(x, edge_index)
    out = jax.block_until_ready(out)

    # correctness check against pure-JAX reference (same bf16 input rounding)
    ref = reference_forward(x, edge_index, net.weight, net.bias)
    assert out.shape == (N, H)
    assert jnp.allclose(out, ref, atol=3e-2, rtol=3e-2), (
        float(jnp.max(jnp.abs(out - ref)))
    )

    print("KERNEL_OK")
</pallas_src>

<mosaic_0001>
module attributes {stable_mosaic.version = 11 : i64} {
  func.func @gcn_relu_kernel(%arg0: i32, %arg1: i32, %arg2: memref<128x128xbf16, #tpu.memory_space<vmem>>, %arg3: memref<128x128xbf16, #tpu.memory_space<vmem>>, %arg4: memref<128x128xf32, #tpu.memory_space<vmem>>, %arg5: memref<1x128xf32, #tpu.memory_space<vmem>>, %arg6: memref<128x128xf32, #tpu.memory_space<vmem>>, %arg7: memref<128x128xf32, #tpu.memory_space<vmem>>) attributes {dimension_semantics = [#tpu.dimension_semantics<parallel>, #tpu.dimension_semantics<arbitrary>], iteration_bounds = array<i64: 1, 1>, scalar_prefetch = 0 : i64, scratch_operands = 1 : i64, tpu.core_type = #tpu.core_type<tc>, window_params = [{transform_indices = @transform_0, window_bounds = array<i64: 128, 128>}, {transform_indices = @transform_1, window_bounds = array<i64: 128, 128>}, {pipeline_mode = #tpu.pipeline_mode<synchronous>, transform_indices = @transform_2, window_bounds = array<i64: 128, 128>}, {pipeline_mode = #tpu.pipeline_mode<synchronous>, transform_indices = @transform_3, window_bounds = array<i64: 1, 128>}, {transform_indices = @transform_4, window_bounds = array<i64: 128, 128>}]} {
    %c0_i32 = arith.constant 0 : i32
    %0 = arith.cmpi eq, %arg1, %c0_i32 : i32
    %1 = arith.extui %0 : i1 to i32
    %c0_i32_0 = arith.constant 0 : i32
    %2 = arith.cmpi ne, %1, %c0_i32_0 : i32
    scf.if %2 {
      %cst_10 = arith.constant 0.000000e+00 : f32
      %12 = vector.broadcast %cst_10 : f32 to vector<128x128xf32>
      %c0_11 = arith.constant 0 : index
      %c0_12 = arith.constant 0 : index
      %13 = vector.load %arg7[%c0_11, %c0_12] : memref<128x128xf32, #tpu.memory_space<vmem>>, vector<128x128xf32>
      tpu.vector_store %arg7[%c0_11, %c0_12], %12 {strides = array<i32>} : memref<128x128xf32, #tpu.memory_space<vmem>>, vector<128x128xf32>,
    } else {
    }
    %c0 = arith.constant 0 : index
    %c0_1 = arith.constant 0 : index
    %3 = vector.load %arg7[%c0, %c0_1] : memref<128x128xf32, #tpu.memory_space<vmem>>, vector<128x128xf32>
    %c0_2 = arith.constant 0 : index
    %c0_3 = arith.constant 0 : index
    %4 = vector.load %arg2[%c0_2, %c0_3] : memref<128x128xbf16, #tpu.memory_space<vmem>>, vector<128x128xbf16>
    %c0_4 = arith.constant 0 : index
    %c0_5 = arith.constant 0 : index
    %5 = vector.load %arg3[%c0_4, %c0_5] : memref<128x128xbf16, #tpu.memory_space<vmem>>, vector<128x128xbf16>
    %cst = arith.constant dense<0.000000e+00> : vector<128x128xf32>
    %6 = tpu.matmul %4, %5, %cst {dimension_numbers = #tpu.dot_dimension_numbers<[1], [0], [0], [1], [0, 0, 1, 1], [], []>} : vector<128x128xbf16>, vector<128x128xbf16>, vector<128x128xf32> -> vector<128x128xf32>
    %7 = arith.addf %3, %6 : vector<128x128xf32>
    %c0_6 = arith.constant 0 : index
    %c0_7 = arith.constant 0 : index
    %8 = vector.load %arg7[%c0_6, %c0_7] : memref<128x128xf32, #tpu.memory_space<vmem>>, vector<128x128xf32>
    tpu.vector_store %arg7[%c0_6, %c0_7], %7 {strides = array<i32>} : memref<128x128xf32, #tpu.memory_space<vmem>>, vector<128x128xf32>,
    %c0_i32_8 = arith.constant 0 : i32
    %9 = arith.cmpi eq, %arg1, %c0_i32_8 : i32
    %10 = arith.extui %9 : i1 to i32
    %c0_i32_9 = arith.constant 0 : i32
    %11 = arith.cmpi ne, %10, %c0_i32_9 : i32
    scf.if %11 {
      %c0_10 = arith.constant 0 : index
      %c0_11 = arith.constant 0 : index
      %12 = vector.load %arg7[%c0_10, %c0_11] : memref<128x128xf32, #tpu.memory_space<vmem>>, vector<128x128xf32>
      %c0_12 = arith.constant 0 : index
      %c0_13 = arith.constant 0 : index
      %13 = vector.load %arg4[%c0_12, %c0_13] : memref<128x128xf32, #tpu.memory_space<vmem>>, vector<128x128xf32>
      %cst_14 = arith.constant dense<0.000000e+00> : vector<128x128xf32>
      %14 = tpu.matmul %12, %13, %cst_14 {dimension_numbers = #tpu.dot_dimension_numbers<[1], [0], [0], [1], [0, 0, 1, 1], [], []>} : vector<128x128xf32>, vector<128x128xf32>, vector<128x128xf32> -> vector<128x128xf32>
      %c0_15 = arith.constant 0 : index
      %c0_16 = arith.constant 0 : index
      %15 = vector.load %arg5[%c0_15, %c0_16] : memref<1x128xf32, #tpu.memory_space<vmem>>, vector<1x128xf32>
      %16 = vector.broadcast %15 : vector<1x128xf32> to vector<128x128xf32>
      %17 = arith.addf %14, %16 : vector<128x128xf32>
      %cst_17 = arith.constant 0.000000e+00 : f32
      %18 = vector.broadcast %cst_17 : f32 to vector<128x128xf32>
      %19 = arith.maximumf %17, %18 : vector<128x128xf32>
      %c0_18 = arith.constant 0 : index
      %c0_19 = arith.constant 0 : index
      %20 = vector.load %arg6[%c0_18, %c0_19] : memref<128x128xf32, #tpu.memory_space<vmem>>, vector<128x128xf32>
      tpu.vector_store %arg6[%c0_18, %c0_19], %19 {strides = array<i32>} : memref<128x128xf32, #tpu.memory_space<vmem>>, vector<128x128xf32>,
    } else {
    }
    return
  }
  func.func @transform_0(%arg0: i32, %arg1: i32) -> (i32, i32) {
    %c0_i32 = arith.constant 0 : i32
    return %arg0, %arg1 : i32, i32
  }
  func.func @transform_1(%arg0: i32, %arg1: i32) -> (i32, i32) {
    %c0_i32 = arith.constant 0 : i32
    %c0_i32_0 = arith.constant 0 : i32
    return %arg1, %c0_i32 : i32, i32
  }
  func.func @transform_2(%arg0: i32, %arg1: i32) -> (i32, i32) {
    %c0_i32 = arith.constant 0 : i32
    %c0_i32_0 = arith.constant 0 : i32
    %c0_i32_1 = arith.constant 0 : i32
    return %c0_i32, %c0_i32_0 : i32, i32
  }
  func.func @transform_3(%arg0: i32, %arg1: i32) -> (i32, i32) {
    %c0_i32 = arith.constant 0 : i32
    %c0_i32_0 = arith.constant 0 : i32
    %c0_i32_1 = arith.constant 0 : i32
    return %c0_i32, %c0_i32_0 : i32, i32
  }
  func.func @transform_4(%arg0: i32, %arg1: i32) -> (i32, i32) {
    %c0_i32 = arith.constant 0 : i32
    %c0_i32_0 = arith.constant 0 : i32
    return %arg0, %c0_i32 : i32, i32
  }
}

</mosaic_0001>

<bundles_post_ra>
// kernel: tpu_custom_call.1
= control target key start
LH: loop header
LB: loop body
LE: loop exit
PB: predicated region body
PF: predicated region fallthrough
CT: control target
= control target key end

     0   :  { %9 = vsyncpa [#allocation4], 0  ;;  %s925_s0 = inlined_call_operand.hbm [shape: bf16[128,128], index: 0, kind: input, shape index: {}]   ;;  %s926_s1 = inlined_call_operand.hbm [shape: bf16[128,128], index: 1, kind: input, shape index: {}]   ;;  %s927_s2 = inlined_call_operand.hbm [shape: f32[128,128], index: 2, kind: input, shape index: {}]   ;;  %s928_s3 = inlined_call_operand.vmem [shape: f32[1,128], index: 3, kind: input, shape index: {}]   ;;  %s929_s4 = inlined_call_operand.hbm [shape: f32[128,128], index: 4, kind: output, shape index: {}]  }
   0x1   :  { %10 = vsyncpa [#allocation7], 0 }
   0x2   :  { %11 = vsyncpa [#allocation5], 0  ;;  %s853_s15 = smov [#allocation6]   ;;  %s854_s17 = smov [#allocation3]  }
   0x3   :  { %s29_s16 = sshll.u32 %s853_s15, 4  ;;  %s17_s18 = sshll.u32 %s854_s17, 4  ;;  %s30_s16 = int_to_ptr.vmem [resolvable:$true] %s29_s16  ;;  %s18_s18 = int_to_ptr.vmem [resolvable:$true] %s17_s18 }
   0x4   :  { %s775_s19 = scalar_lea.vmem %s30_s16, 1024  ;;  %p780_p1 = scmp.lt.s32.totalorder %s30_s16, %s30_s16 }
   0x5   :  { %p776_p0 = scmp.ne.s32.totalorder %s30_s16, %s775_s19  ;;  %p781_p2 = scmp.lt.s32.totalorder %s775_s19, %s775_s19 }
   0x7   :  { %p782_p3 = por %p781_p2, %p780_p1 }
   0x9   :  { %p783_p4 = pnand %p782_p3, %p776_p0 }
   0xb   :  { %786 = shalt.err (!%p783_p4)
}
   0xc   :  { %s855_s20 = smov 64   ;;  %s856_s21 = smov 4  }
   0xd   :  { %35 = dma.hbm_to_vmem [thread:$0]  %s926_s1, 1024, %s30_s16, [#allocation7], %s855_s20, %s855_s20, %s856_s21  }
   0xe   :  { %s795_s24 = scalar_lea.vmem %s18_s18, 1024  ;;  %p800_p6 = scmp.lt.s32.totalorder %s18_s18, %s18_s18 }
   0xf   :  { %p796_p5 = scmp.ne.s32.totalorder %s18_s18, %s795_s24  ;;  %p801_p7 = scmp.lt.s32.totalorder %s795_s24, %s795_s24 }
  0x11   :  { %p802_p8 = por %p801_p7, %p800_p6 }
  0x13   :  { %p803_p9 = pnand %p802_p8, %p796_p5 }
  0x15   :  { %806 = shalt.err (!%p803_p9)
}
  0x16   :  { %23 = dma.hbm_to_vmem [thread:$0]  %s925_s0, 1024, %s18_s18, [#allocation4], %s855_s20, %s855_s20, %s856_s21  }
  0x17   :  { %s857_s27 = smov [#allocation8]  }
  0x18   :  { %s41_s28 = sshll.u32 %s857_s27, 4  ;;  %s42_s28 = int_to_ptr.vmem [resolvable:$true] %s41_s28 }
  0x19   :  { %s815_s29 = scalar_lea.vmem %s42_s28, 2048  ;;  %p820_p11 = scmp.lt.s32.totalorder %s42_s28, %s42_s28 }
  0x1a   :  { %p816_p10 = scmp.ne.s32.totalorder %s42_s28, %s815_s29  ;;  %p821_p12 = scmp.lt.s32.totalorder %s815_s29, %s815_s29 }
  0x1c   :  { %p822_p13 = por %p821_p12, %p820_p11 }
  0x1e   :  { %p823_p0 = pnand %p822_p13, %p816_p10 }
  0x20   :  { %826 = shalt.err (!%p823_p0)
}
  0x21   :  { %s858_s1 = smov 128   ;;  %s859_s30 = smov 8  }
  0x22   :  { %47 = dma.hbm_to_vmem [thread:$0]  %s927_s2, 2048, %s42_s28, [#allocation7], %s858_s1, %s858_s1, %s859_s30  }
  0x23   :  { %847 = dma.done.wait [#allocation4], 1024  }
  0x24   :  { %848 = vsyncadd [#allocation4], 4294966272 }
  0x25   :  { %849 = dma.done.wait [#allocation7], 3072  }
  0x26   :  { %850 = vsyncadd [#allocation7], 4294964224  ;;  %v751_v0 = vld [vmem:[#allocation6 + $0x38] sm:$0xff]   ;;  %v752_v1 = vld [vmem:[#allocation6 + $0x30] sm:$0xff]  }
  0x27   :  { %655 = vmatprep.subr.bf16.mxu0 %v751_v0  ;;  %v753_v2 = vld [vmem:[#allocation6 + $0x28] sm:$0xff]   ;;  %v754_v3 = vld [vmem:[#allocation6 + $0x20] sm:$0xff]   ;;  %v755_v5 = vld [vmem:[#allocation6 + $0x18] sm:$0xff]  }
  0x28   :  { %656 = vmatpush3.bf16.msra.mxu0 %v751_v0  ;;  %v759_v4 = vld [vmem:[#allocation3] sm:$0xff]   ;;  %v756_v6 = vld [vmem:[#allocation6 + $0x10] sm:$0xff]   ;;  %v387_v7 = vld [vmem:[#allocation8 + $0x78] sm:$0xff] }
  0x29   :  { %657 = vmatprep.subr.bf16.mxu0 %v752_v1  ;;  %671 = vmatprep.mubr.bf16.mxu0 %v759_v4  ;;  %v386_v8 = vld [vmem:[#allocation8 + $0x70] sm:$0xff]  ;;  %v385_v9 = vld [vmem:[#allocation8 + $0x68] sm:$0xff]  ;;  %v384_v11 = vld [vmem:[#allocation8 + $0x60] sm:$0xff] }
  0x2a   :  { %687 = vmatprep.subr.mxu1 %v387_v7  ;;  %v757_v10 = vld [vmem:[#allocation6 + $0x8] sm:$0xff]   ;;  %v383_v12 = vld [vmem:[#allocation8 + $0x58] sm:$0xff]  ;;  %v758_v13 = vld [vmem:[#allocation6] sm:$0xff]  }
  0x2b   :  { %688 = vmatpush3.msra.mxu1 %v387_v7  ;;  %v382_v14 = vld [vmem:[#allocation8 + $0x50] sm:$0xff]  ;;  %v381_v15 = vld [vmem:[#allocation8 + $0x48] sm:$0xff]  ;;  %v380_v16 = vld [vmem:[#allocation8 + $0x40] sm:$0xff] }
  0x2c   :  { %658 = vmatpush3.bf16.msra.mxu0 %v752_v1  ;;  %689 = vmatprep.subr.mxu1 %v386_v8  ;;  %v760_v17 = vld [vmem:[#allocation3 + $0x8] sm:$0xff]   ;;  %v379_v18 = vld [vmem:[#allocation8 + $0x38] sm:$0xff]  ;;  %v761_v19 = vld [vmem:[#allocation3 + $0x10] sm:$0xff]  }
  0x2d   :  { %659 = vmatprep.subr.bf16.mxu0 %v753_v2  ;;  %690 = vmatpush3.msra.mxu1 %v386_v8  ;;  %v378_v20 = vld [vmem:[#allocation8 + $0x30] sm:$0xff]  ;;  %v377_v21 = vld [vmem:[#allocation8 + $0x28] sm:$0xff]  ;;  %v376_v22 = vld [vmem:[#allocation8 + $0x20] sm:$0xff] }
  0x2e   :  { %691 = vmatprep.subr.mxu1 %v385_v9  ;;  %v762_v23 = vld [vmem:[#allocation3 + $0x18] sm:$0xff]   ;;  %v763_v25 = vld [vmem:[#allocation3 + $0x20] sm:$0xff]   ;;  %v764_v26 = vld [vmem:[#allocation3 + $0x28] sm:$0xff]  }
  0x2f   :  { %692 = vmatpush3.msra.mxu1 %v385_v9  ;;  %v375_v24 = vld [vmem:[#allocation8 + $0x18] sm:$0xff]  ;;  %v765_v27 = vld [vmem:[#allocation3 + $0x30] sm:$0xff]   ;;  %v373_v30 = vld [vmem:[#allocation8 + $0x8] sm:$0xff] }
  0x30   :  { %660 = vmatpush3.bf16.msra.mxu0 %v753_v2  ;;  %693 = vmatprep.subr.mxu1 %v384_v11  ;;  %v766_v28 = vld [vmem:[#allocation3 + $0x38] sm:$0xff]   ;;  %v374_v29 = vld [vmem:[#allocation8 + $0x10] sm:$0xff]  ;;  %v372_v31 = vld [vmem:[#allocation8] sm:$0xff] }
  0x31   :  { %661 = vmatprep.subr.bf16.mxu0 %v754_v3  ;;  %694 = vmatpush3.msra.mxu1 %v384_v11  ;;  %v901_v48 = vld [vmem:[%s928_s3] ss:$0 sm:$0xff]  ;;  %s860_s3 = smov [#allocation9]  }
  0x32   :  { %695 = vmatprep.subr.mxu1 %v383_v12  ;;  %s577_s7 = sshll.u32 %s860_s3, 4  ;;  %s578_s7 = int_to_ptr.vmem [resolvable:$true] %s577_s7 }
  0x33   :  { %696 = vmatpush3.msra.mxu1 %v383_v12  ;;  %s827_s8 = scalar_lea.vmem %s578_s7, 2048  ;;  %p832_p2 = scmp.lt.s32.totalorder %s578_s7, %s578_s7 }
  0x34   :  { %662 = vmatpush3.bf16.msra.mxu0 %v754_v3  ;;  %697 = vmatprep.subr.mxu1 %v382_v14  ;;  %p828_p1 = scmp.ne.s32.totalorder %s578_s7, %s827_s8  ;;  %p833_p3 = scmp.lt.s32.totalorder %s827_s8, %s827_s8 }
  0x35   :  { %663 = vmatprep.subr.bf16.mxu0 %v755_v5  ;;  %698 = vmatpush3.msra.mxu1 %v382_v14 }
  0x36   :  { %699 = vmatprep.subr.mxu1 %v381_v15  ;;  %p834_p4 = por %p833_p3, %p832_p2 }
  0x37   :  { %700 = vmatpush3.msra.mxu1 %v381_v15 }
  0x38   :  { %664 = vmatpush3.bf16.msra.mxu0 %v755_v5  ;;  %701 = vmatprep.subr.mxu1 %v380_v16  ;;  %p835_p5 = pnand %p834_p4, %p828_p1 }
  0x39   :  { %665 = vmatprep.subr.bf16.mxu0 %v756_v6  ;;  %702 = vmatpush3.msra.mxu1 %v380_v16 }
  0x3a   :  { %703 = vmatprep.subr.mxu1 %v379_v18 }
  0x3b   :  { %704 = vmatpush3.msra.mxu1 %v379_v18 }
  0x3c   :  { %666 = vmatpush3.bf16.msra.mxu0 %v756_v6  ;;  %705 = vmatprep.subr.mxu1 %v378_v20 }
  0x3d   :  { %667 = vmatprep.subr.bf16.mxu0 %v757_v10  ;;  %706 = vmatpush3.msra.mxu1 %v378_v20 }
  0x3e   :  { %707 = vmatprep.subr.mxu1 %v377_v21 }
  0x3f   :  { %708 = vmatpush3.msra.mxu1 %v377_v21 }
  0x40   :  { %668 = vmatpush3.bf16.msra.mxu0 %v757_v10  ;;  %709 = vmatprep.subr.mxu1 %v376_v22 }
  0x41   :  { %669 = vmatprep.subr.bf16.mxu0 %v758_v13  ;;  %710 = vmatpush3.msra.mxu1 %v376_v22 }
  0x42   :  { %711 = vmatprep.subr.mxu1 %v375_v24 }
  0x43   :  { %712 = vmatpush3.msra.mxu1 %v375_v24 }
  0x44   :  { %670 = vmatpush3.bf16.msra.mxu0 %v758_v13  ;;  %713 = vmatprep.subr.mxu1 %v374_v29 }
  0x45   :  { %714 = vmatpush3.msra.mxu1 %v374_v29 }
  0x46   :  { %715 = vmatprep.subr.mxu1 %v373_v30 }
  0x47   :  { %672 = vmatmul.mubr.bf16.vlgmr.msra.gmra.mxu0 %v760_v17  ;;  %716 = vmatpush3.msra.mxu1 %v373_v30 }
  0x48   :  { %675 = vmatprep.mubr.bf16.mxu0 %v761_v19  ;;  %717 = vmatprep.subr.mxu1 %v372_v31 }
  0x49   :  { %718 = vmatpush3.msra.mxu1 %v372_v31 }
  0x4f   :  { %676 = vmatmul.mubr.bf16.gmra.mxu0 %v762_v23 }
  0x50   :  { %679 = vmatprep.mubr.bf16.mxu0 %v763_v25 }
  0x57   :  { %680 = vmatmul.mubr.bf16.gmra.mxu0 %v764_v26 }
  0x58   :  { %683 = vmatprep.mubr.bf16.mxu0 %v765_v27 }
  0x5f   :  { %684 = vmatmul.mubr.bf16.gmra.mxu0 %v766_v28 }
 0x107   :  { %v673_v32 = vpop.f32.mrf.mxu0 }
 0x109   :  { %v258_v33 = vpop.f32.mrf.mxu0 }
 0x10a   :  { %719 = vmatprep.mubr.f32.mxu1 %v258_v33 }
 0x10b   :  { %v674_v34 = vpop.f32.mrf.mxu0 }
 0x10d   :  { %v261_v35 = vpop.f32.mrf.mxu0 }
 0x10e   :  { %720 = vmatmul.mubr.f32.vlgmr.msra.gmra.mxu1 %v261_v35 }
 0x10f   :  { %v677_v36 = vpop.f32.mrf.mxu0  ;;  %722 = vmatprep.mubr.f32.mxu1 %v673_v32 }
 0x111   :  { %v274_v37 = vpop.f32.mrf.mxu0 }
 0x112   :  { %723 = vmatmul.mubr.f32.gmra.mxu1 %v674_v34 }
 0x113   :  { %v678_v38 = vpop.f32.mrf.mxu0  ;;  %725 = vmatprep.mubr.f32.mxu1 %v274_v37 }
 0x115   :  { %v277_v39 = vpop.f32.mrf.mxu0 }
 0x116   :  { %726 = vmatmul.mubr.f32.gmra.mxu1 %v277_v39 }
 0x117   :  { %v681_v40 = vpop.f32.mrf.mxu0  ;;  %728 = vmatprep.mubr.f32.mxu1 %v677_v36 }
 0x119   :  { %v290_v41 = vpop.f32.mrf.mxu0 }
 0x11a   :  { %729 = vmatmul.mubr.f32.gmra.mxu1 %v678_v38 }
 0x11b   :  { %v682_v42 = vpop.f32.mrf.mxu0  ;;  %731 = vmatprep.mubr.f32.mxu1 %v290_v41 }
 0x11d   :  { %v293_v43 = vpop.f32.mrf.mxu0 }
 0x11e   :  { %732 = vmatmul.mubr.f32.gmra.mxu1 %v293_v43 }
 0x11f   :  { %v685_v44 = vpop.f32.mrf.mxu0  ;;  %734 = vmatprep.mubr.f32.mxu1 %v681_v40 }
 0x121   :  { %v306_v45 = vpop.f32.mrf.mxu0 }
 0x122   :  { %735 = vmatmul.mubr.f32.gmra.mxu1 %v682_v42 }
 0x123   :  { %v686_v46 = vpop.f32.mrf.mxu0  ;;  %737 = vmatprep.mubr.f32.mxu1 %v306_v45 }
 0x125   :  { %v309_v47 = vpop.f32.mrf.mxu0 }
 0x126   :  { %738 = vmatmul.mubr.f32.gmra.mxu1 %v309_v47 }
 0x127   :  { %740 = vmatprep.mubr.f32.mxu1 %v685_v44 }
 0x12a   :  { %741 = vmatmul.mubr.f32.gmra.mxu1 %v686_v46 }
 0x1ce   :  { %v721_v49 = vpop.f32.mrf.mxu1 }
 0x1cf   :  { %v467_v50 = vadd.f32 %v721_v49, %v901_v48 }
 0x1d0   :  { %v461_v51 = vpop.f32.mrf.mxu1 }
 0x1d1   :  { %v541_v52 = vmax.f32 %v467_v50, 0.0  ;;  %v462_v53 = vadd.f32 %v901_v48, %v461_v51 }
 0x1d2   :  { %v724_v54 = vpop.f32.mrf.mxu1 }
 0x1d3   :  { %557 = vst [vmem:[#allocation9 + $0x8] sm:$0xff] %v541_v52  ;;  %v540_v55 = vmax.f32 %v462_v53, 0.0  ;;  %v477_v56 = vadd.f32 %v724_v54, %v901_v48 }
 0x1d4   :  { %v471_v57 = vpop.f32.mrf.mxu1 }
 0x1d5   :  { %556 = vst [vmem:[#allocation9] sm:$0xff] %v540_v55  ;;  %v543_v58 = vmax.f32 %v477_v56, 0.0  ;;  %v472_v59 = vadd.f32 %v901_v48, %v471_v57 }
 0x1d6   :  { %v727_v60 = vpop.f32.mrf.mxu1 }
 0x1d7   :  { %559 = vst [vmem:[#allocation9 + $0x18] sm:$0xff] %v543_v58  ;;  %v542_v61 = vmax.f32 %v472_v59, 0.0  ;;  %v487_v62 = vadd.f32 %v727_v60, %v901_v48 }
 0x1d8   :  { %v481_v63 = vpop.f32.mrf.mxu1 }
 0x1d9   :  { %558 = vst [vmem:[#allocation9 + $0x10] sm:$0xff] %v542_v61  ;;  %v545_v0 = vmax.f32 %v487_v62, 0.0  ;;  %v482_v1 = vadd.f32 %v901_v48, %v481_v63 }
 0x1da   :  { %v730_v2 = vpop.f32.mrf.mxu1 }
 0x1db   :  { %561 = vst [vmem:[#allocation9 + $0x28] sm:$0xff] %v545_v0  ;;  %v544_v3 = vmax.f32 %v482_v1, 0.0  ;;  %v497_v4 = vadd.f32 %v730_v2, %v901_v48 }
 0x1dc   :  { %v491_v5 = vpop.f32.mrf.mxu1 }
 0x1dd   :  { %560 = vst [vmem:[#allocation9 + $0x20] sm:$0xff] %v544_v3  ;;  %v547_v6 = vmax.f32 %v497_v4, 0.0  ;;  %v492_v7 = vadd.f32 %v901_v48, %v491_v5 }
 0x1de   :  { %v733_v8 = vpop.f32.mrf.mxu1 }
 0x1df   :  { %563 = vst [vmem:[#allocation9 + $0x38] sm:$0xff] %v547_v6  ;;  %v546_v9 = vmax.f32 %v492_v7, 0.0  ;;  %v507_v10 = vadd.f32 %v733_v8, %v901_v48 }
 0x1e0   :  { %v501_v11 = vpop.f32.mrf.mxu1 }
 0x1e1   :  { %562 = vst [vmem:[#allocation9 + $0x30] sm:$0xff] %v546_v9  ;;  %v549_v12 = vmax.f32 %v507_v10, 0.0  ;;  %v502_v13 = vadd.f32 %v901_v48, %v501_v11 }
 0x1e2   :  { %v736_v14 = vpop.f32.mrf.mxu1 }
 0x1e3   :  { %565 = vst [vmem:[#allocation9 + $0x48] sm:$0xff] %v549_v12  ;;  %v548_v15 = vmax.f32 %v502_v13, 0.0  ;;  %v517_v16 = vadd.f32 %v736_v14, %v901_v48 }
 0x1e4   :  { %v511_v17 = vpop.f32.mrf.mxu1 }
 0x1e5   :  { %564 = vst [vmem:[#allocation9 + $0x40] sm:$0xff] %v548_v15  ;;  %v551_v18 = vmax.f32 %v517_v16, 0.0  ;;  %v512_v19 = vadd.f32 %v901_v48, %v511_v17 }
 0x1e6   :  { %v739_v20 = vpop.f32.mrf.mxu1 }
 0x1e7   :  { %567 = vst [vmem:[#allocation9 + $0x58] sm:$0xff] %v551_v18  ;;  %v550_v21 = vmax.f32 %v512_v19, 0.0  ;;  %v527_v22 = vadd.f32 %v739_v20, %v901_v48 }
 0x1e8   :  { %v521_v23 = vpop.f32.mrf.mxu1 }
 0x1e9   :  { %566 = vst [vmem:[#allocation9 + $0x50] sm:$0xff] %v550_v21  ;;  %v553_v24 = vmax.f32 %v527_v22, 0.0  ;;  %v522_v25 = vadd.f32 %v901_v48, %v521_v23 }
 0x1ea   :  { %v742_v26 = vpop.f32.mrf.mxu1 }
 0x1eb   :  { %569 = vst [vmem:[#allocation9 + $0x68] sm:$0xff] %v553_v24  ;;  %v552_v27 = vmax.f32 %v522_v25, 0.0  ;;  %v537_v28 = vadd.f32 %v742_v26, %v901_v48 }
 0x1ec   :  { %v531_v29 = vpop.f32.mrf.mxu1 }
 0x1ed   :  { %568 = vst [vmem:[#allocation9 + $0x60] sm:$0xff] %v552_v27  ;;  %v555_v30 = vmax.f32 %v537_v28, 0.0  ;;  %v532_v31 = vadd.f32 %v901_v48, %v531_v29 }
 0x1ef   :  { %571 = vst [vmem:[#allocation9 + $0x78] sm:$0xff] %v555_v30  ;;  %v554_v32 = vmax.f32 %v532_v31, 0.0 }
 0x1f1   :  { %570 = vst [vmem:[#allocation9 + $0x70] sm:$0xff] %v554_v32 }
 0x1f2   :  { %838 = shalt.err (!%p835_p5)
}
 0x1f3   :  { %583 = dma.vmem_to_hbm [thread:$0]  %s578_s7, 2048, %s929_s4, [#allocation5], %s858_s1, %s858_s1, %s859_s30  }
 0x1f4   :  { %851 = dma.done.wait [#allocation5], 2048  }
 0x1f5   :  { %852 = vsyncadd [#allocation5], 4294965248 }
 0x1f6   :  { %587 = vsyncpa [#allocation4], 1 }
 0x1f7   :  { %588 = vsyncpa [#allocation7], 1 }
 0x1f8   :  { %589 = vsyncpa [#allocation5], 1 }

</bundles_post_ra>
